<compile_context>
chip_gen: v6e
topology: v6e:2x2x1
jax: 0.10.0
libtpu: 0.0.40
codegen_flags: <defaults>
</compile_context>

<pallas_src>
import jax
import jax.numpy as jnp
from jax.experimental import pallas as pl
from jax.experimental.pallas import tpu as pltpu

# Contract the last dim of both operands: out[b, c] = sum_d x[b, d] * w[c, d].
_NT_DIMS = (((1,), (1,)), ((), ()))


def _linear_kernel(x_ref, w_ref, b_ref, o_ref):
    # out = x @ W^T + b : MXU matmul + VPU bias add, everything VMEM-resident.
    acc = jax.lax.dot_general(
        x_ref[...], w_ref[...], _NT_DIMS, preferred_element_type=jnp.float32
    )
    o_ref[...] = (acc + b_ref[...]).astype(o_ref.dtype)


def _norm_linear_kernel(x_ref, w_ref, b_ref, o_ref):
    # Fused NormalizeInput + Linear in one dispatch (single HBM read of raw x).
    # Scale the tiny (C, D) weight by 1/col_max instead of dividing all of x:
    # (x / col_max) @ W^T == x @ (W / col_max)^T.  Exact divide.
    x = x_ref[...]                                  # (B, D)
    col_max = jnp.max(x, axis=0, keepdims=True)     # (1, D) sublane reduce (XLU)
    w_eff = w_ref[...] / col_max                    # (C, D) / (1, D): 22 divides
    acc = jax.lax.dot_general(x, w_eff, _NT_DIMS, preferred_element_type=jnp.float32)
    o_ref[...] = (acc + b_ref[...]).astype(o_ref.dtype)


def loan_eligibility_forward(x, weight, bias, *, fuse_normalize=False, tb=2048):
    """Forward pass of LoanEligibilityPredictor.

    x:      (B, D) float32 (raw features if fuse_normalize=True, else pre-normalized)
    weight: (C, D) float32 — PyTorch-native nn.Linear weight layout
    bias:   (C,)   float32
    """
    B, D = x.shape
    C = weight.shape[0]
    b2 = bias.reshape(1, C)

    if B <= tb:
        # Single-block path: no grid machinery at all; each operand is a
        # whole-array VMEM block. Normalization fused in-kernel (one dispatch).
        vmem = pl.BlockSpec(memory_space=pltpu.MemorySpace.VMEM)
        kernel = _norm_linear_kernel if fuse_normalize else _linear_kernel
        return pl.pallas_call(
            kernel,
            out_shape=jax.ShapeDtypeStruct((B, C), x.dtype),
            in_specs=[vmem, vmem, vmem],
            out_specs=vmem,
        )(x, weight, b2)

    # Batch-tiled scaling path.
    w_eff = weight
    if fuse_normalize:
        # Global column max (must be computed over the FULL batch before tiling
        # so every tile — including a partial last tile — sees the same scale).
        # One streaming read of x; the scale is folded into the 2x11 weight so
        # normalized x is never materialized and the kernel reads raw x once.
        # NOTE: matches the PyTorch module — no epsilon guard for a zero column max.
        col_max = jnp.max(x, axis=0, keepdims=True)     # (1, D)
        w_eff = weight / col_max                        # exact divide, tiny op

    return pl.pallas_call(
        _linear_kernel,
        out_shape=jax.ShapeDtypeStruct((B, C), x.dtype),
        grid=(pl.cdiv(B, tb),),
        in_specs=[
            pl.BlockSpec((tb, D), lambda i: (i, 0)),    # x: streamed batch tiles
            pl.BlockSpec((C, D), lambda i: (0, 0)),     # W (already scaled): resident
            pl.BlockSpec((1, C), lambda i: (0, 0)),     # b: resident
        ],
        out_specs=pl.BlockSpec((tb, C), lambda i: (i, 0)),
        compiler_params=pltpu.CompilerParams(
            # Independent batch tiles -> shard across v7x's 2 TensorCores.
            dimension_semantics=("parallel",)
        ),
    )(x, w_eff, b2)


if __name__ == "__main__":
    # Module config implied by the script: 11 input feature columns, 2 classes.
    input_size = 11
    num_classes = 2
    batch = 8

    key = jax.random.PRNGKey(0)
    kx, kw, kb, kx2 = jax.random.split(key, 4)

    # Deterministic PyTorch-style Linear init: U(-1/sqrt(in), 1/sqrt(in)).
    bound = 1.0 / (input_size ** 0.5)
    w = jax.random.uniform(kw, (num_classes, input_size), jnp.float32, -bound, bound)
    b = jax.random.uniform(kb, (num_classes,), jnp.float32, -bound, bound)

    # Raw positive features; NormalizeInput (column-wise max) fused in-kernel.
    x_raw = jax.random.uniform(kx, (batch, input_size), jnp.float32, 0.1, 10.0)

    out = loan_eligibility_forward(x_raw, w, b, fuse_normalize=True)
    out = jax.block_until_ready(out)

    x_norm = x_raw / jnp.max(x_raw, axis=0, keepdims=True)
    ref = x_norm @ w.T + b
    assert out.shape == (batch, num_classes)
    assert jnp.allclose(out, ref, atol=1e-5, rtol=1e-5)

    # Plain (pre-normalized) small-batch path — the module's forward() as-is.
    out_plain = jax.block_until_ready(loan_eligibility_forward(x_norm, w, b))
    assert jnp.allclose(out_plain, ref, atol=1e-5, rtol=1e-5)

    # Batch-tiled scaling path: 8192 rows / tb=2048 -> 4 grid steps (>=2 per
    # TensorCore on v7x), W/b VMEM-resident, raw x streamed exactly once.
    big_batch = 8192
    xb_raw = jax.random.uniform(kx2, (big_batch, input_size), jnp.float32, 0.1, 10.0)
    out_big = jax.block_until_ready(
        loan_eligibility_forward(xb_raw, w, b, fuse_normalize=True, tb=2048)
    )
    ref_big = (xb_raw / jnp.max(xb_raw, axis=0, keepdims=True)) @ w.T + b
    assert out_big.shape == (big_batch, num_classes)
    assert jnp.allclose(out_big, ref_big, atol=1e-5, rtol=1e-5)

    print("KERNEL_OK")
</pallas_src>

<mosaic_0001>
module attributes {stable_mosaic.version = 11 : i64} {
  func.func @_norm_linear_kernel(%arg0: memref<8x11xf32, #tpu.memory_space<vmem>>, %arg1: memref<2x11xf32, #tpu.memory_space<vmem>>, %arg2: memref<1x2xf32, #tpu.memory_space<vmem>>, %arg3: memref<8x2xf32, #tpu.memory_space<vmem>>) attributes {dimension_semantics = [], scalar_prefetch = 0 : i64, scratch_operands = 0 : i64, tpu.core_type = #tpu.core_type<tc>} {
    %c0 = arith.constant 0 : index
    %c0_0 = arith.constant 0 : index
    %0 = vector.load %arg0[%c0, %c0_0] : memref<8x11xf32, #tpu.memory_space<vmem>>, vector<8x11xf32>
    %cst = arith.constant dense<0xFF800000> : vector<11xf32>
    %1 = vector.multi_reduction <maximumf>, %0, %cst [0] : vector<8x11xf32> to vector<11xf32>
    %2 = vector.shape_cast %1 : vector<11xf32> to vector<1x11xf32>
    %c0_1 = arith.constant 0 : index
    %c0_2 = arith.constant 0 : index
    %3 = vector.load %arg1[%c0_1, %c0_2] : memref<2x11xf32, #tpu.memory_space<vmem>>, vector<2x11xf32>
    %4 = vector.broadcast %2 : vector<1x11xf32> to vector<2x11xf32>
    %5 = arith.divf %3, %4 : vector<2x11xf32>
    %cst_3 = arith.constant dense<0.000000e+00> : vector<8x2xf32>
    %6 = tpu.matmul %0, %5, %cst_3 {dimension_numbers = #tpu.dot_dimension_numbers<[1], [1], [0], [0], [0, 0, 1, 0], [], []>} : vector<8x11xf32>, vector<2x11xf32>, vector<8x2xf32> -> vector<8x2xf32>
    %c0_4 = arith.constant 0 : index
    %c0_5 = arith.constant 0 : index
    %7 = vector.load %arg2[%c0_4, %c0_5] : memref<1x2xf32, #tpu.memory_space<vmem>>, vector<1x2xf32>
    %8 = vector.broadcast %7 : vector<1x2xf32> to vector<8x2xf32>
    %9 = arith.addf %6, %8 : vector<8x2xf32>
    %c0_6 = arith.constant 0 : index
    %c0_7 = arith.constant 0 : index
    %10 = vector.load %arg3[%c0_6, %c0_7] : memref<8x2xf32, #tpu.memory_space<vmem>>, vector<8x2xf32>
    tpu.vector_store %arg3[%c0_6, %c0_7], %9 {strides = array<i32>} : memref<8x2xf32, #tpu.memory_space<vmem>>, vector<8x2xf32>,
    return
  }
}

</mosaic_0001>

<bundles_post_ra>
// kernel: tpu_custom_call.1
= control target key start
LH: loop header
LB: loop body
LE: loop exit
PB: predicated region body
PF: predicated region fallthrough
CT: control target
= control target key end

     0   :  { %8 = vsyncpa [#allocation3], 0  ;;  %s237_s0 = inlined_call_operand.hbm [shape: f32[8,11], index: 0, kind: input, shape index: {}]   ;;  %s238_s1 = inlined_call_operand.hbm [shape: f32[2,11], index: 1, kind: input, shape index: {}]   ;;  %s239_s2 = inlined_call_operand.vmem [shape: f32[1,2], index: 2, kind: input, shape index: {}]   ;;  %s240_s3 = inlined_call_operand.vmem [shape: f32[8,2], index: 3, kind: output, shape index: {}]  }
   0x1   :  { %9 = vsyncpa [#allocation5], 0  ;;  %s201_s12 = smov [#allocation2]   ;;  %s202_s14 = smov [#allocation4]  }
   0x2   :  { %s16_s13 = sshll.u32 %s201_s12, 4  ;;  %s26_s15 = sshll.u32 %s202_s14, 4  ;;  %s17_s13 = int_to_ptr.vmem [resolvable:$true] %s16_s13  ;;  %s27_s15 = int_to_ptr.vmem [resolvable:$true] %s26_s15 }
   0x3   :  { %s165_s16 = scalar_lea.vmem %s17_s13, 128  ;;  %p170_p1 = scmp.lt.s32.totalorder %s17_s13, %s17_s13 }
   0x4   :  { %p166_p0 = scmp.ne.s32.totalorder %s17_s13, %s165_s16  ;;  %p171_p2 = scmp.lt.s32.totalorder %s165_s16, %s165_s16 }
   0x6   :  { %p172_p3 = por %p171_p2, %p170_p1 }
   0x8   :  { %p173_p4 = pnand %p172_p3, %p166_p0 }
   0xa   :  { %176 = shalt.err (!%p173_p4)
}
   0xb   :  { %19 = dma.hbm_to_vmem [thread:$0]  %s237_s0, 128, %s17_s13, [#allocation3]  }
   0xc   :  { %s185_s19 = scalar_lea.vmem %s27_s15, 32  ;;  %p190_p6 = scmp.lt.s32.totalorder %s27_s15, %s27_s15 }
   0xd   :  { %p186_p5 = scmp.ne.s32.totalorder %s27_s15, %s185_s19  ;;  %p191_p7 = scmp.lt.s32.totalorder %s185_s19, %s185_s19 }
   0xf   :  { %p192_p8 = por %p191_p7, %p190_p6 }
  0x11   :  { %p193_p9 = pnand %p192_p8, %p186_p5 }
  0x13   :  { %196 = shalt.err (!%p193_p9)
}
  0x14   :  { %29 = dma.hbm_to_vmem [thread:$0]  %s238_s1, 32, %s27_s15, [#allocation5]  }
  0x15   :  { %197 = dma.done.wait [#allocation3], 128  }
  0x16   :  { %198 = vsyncadd [#allocation3], 4294967168 }
  0x17   :  { %199 = dma.done.wait [#allocation5], 32  }
  0x18   :  { %200 = vsyncadd [#allocation5], 4294967264  ;;  %v203_v0 = vmov 0.0   ;;  %vm204_vm0 = vmmov 0   ;;  %vm39_vm1 = vcmask 89088   ;;  %v38_v1 = vld [vmem:[#allocation2] sm:$0xff] }
  0x19   :  { %146 = vmatprep.subr.mxu0 %v203_v0  ;;  %148 = vmatprep.mubr.msk.f32.mxu0 %vm204_vm0, %v203_v0  ;;  %v40_v2 = vsel %vm39_vm1, %v38_v1, -inf  ;;  %v47_v9 = vld [vmem:[#allocation4] sm:$0x3]  ;;  %v141_v12 = vld [vmem:[%s239_s2] ss:$0 sm:$0xff]  ;;  %vm133_vm2 = vcmask 15360  }
  0x1a   :  { %v41_v3 = vrot.slane %v40_v2, 4 }
  0x1c   :  { %v42_v4 = vmax.f32 %v40_v2, %v41_v3 }
  0x1e   :  { %v43_v5 = vrot.slane %v42_v4, 2 }
  0x20   :  { %v44_v6 = vmax.f32 %v42_v4, %v43_v5 }
  0x22   :  { %v45_v7 = vrot.slane %v44_v6, 1 }
  0x24   :  { %v46_v8 = vmax.f32 %v44_v6, %v45_v7 }
  0x26   :  { %155 = vrcp.f32 %v46_v8 }
  0x33   :  { %v156_v10 = vpop.eup %155 }
  0x34   :  { %v49_v11 = vmul.f32 %v156_v10, %v47_v9 }
  0x36   :  { %147 = vmatpush3.xpose.msk.msra.mxu0 %vm39_vm1, %v49_v11 }
  0x39   :  { %149 = vmatmul.mubr.msk.f32.vlgmr.msra.gmra.mxu0 %vm39_vm1, %v38_v1 }
  0xf9   :  { %v129_v13 = vpop.f32.mrf.mxu0 }
  0xfa   :  { %v130_v14 = vadd.f32 %v141_v12, %v129_v13 }
  0xfb   :  { %v150_v15 = vpop.f32.mrf.mxu0 }
  0xfc   :  { %134 = vst.msk [vmem:[%s240_s3] sm:$0xff] %vm133_vm2, %v130_v14 }
  0xfd   :  { %139 = vsyncpa [#allocation3], 1 }
  0xfe   :  { %140 = vsyncpa [#allocation5], 1 }

</bundles_post_ra>
